<compile_context>
chip_gen: v7x
topology: tpu7x:2x2x1
jax: 0.10.0
libtpu: 0.0.40
codegen_flags: <defaults>
</compile_context>

<pallas_src>
import functools

import jax
import jax.numpy as jnp
from jax.experimental import pallas as pl
from jax.experimental.pallas import tpu as pltpu

EPS = 1e-5


def _round_up(x, m):
    return (x + m - 1) // m * m


# ---------------------------------------------------------------------------
# Pass 1: partial sum / sum-of-squares of q = x @ wq + bq over one HW tile.
# ---------------------------------------------------------------------------
def _qstats_kernel(x_ref, wq_ref, bq_ref, stats_ref, *, hw, block_hw):
    x = x_ref[0].astype(wq_ref.dtype)                 # cast under the matmul
    q = jnp.dot(x, wq_ref[...],
                preferred_element_type=jnp.float32) + bq_ref[...]      # (thw, Ck)
    rows = (jax.lax.broadcasted_iota(jnp.int32, (block_hw, 1), 0)
            + pl.program_id(1) * block_hw)
    valid = (rows < hw).astype(jnp.float32)           # mask HW padding rows
    qv = q * valid
    s1 = jnp.sum(qv, axis=0, keepdims=True)           # (1, Ck)
    s2 = jnp.sum(qv * q, axis=0, keepdims=True)       # (1, Ck)
    stats_ref[0, 0] = jnp.concatenate([s1, s2], axis=0)


# ---------------------------------------------------------------------------
# Pass 2: attention + single out-projection + partial output-norm statistics.
# ---------------------------------------------------------------------------
def _attn_kernel(x_ref, kT_ref, v_ref, bias_ref, qmean_ref, qmul_ref,
                 wq_ref, bq_ref, wo_ref, bo_ref,
                 y_ref, ostats_ref,
                 *, num_heads, key_channels, value_channels, hw, block_hw):
    cdt = wq_ref.dtype
    x = x_ref[0].astype(cdt)                          # (thw, Cv)
    kT = kT_ref[0]                                    # (Ck, NLp)  masked, cdt
    v = v_ref[0]                                      # (NLp, Cval) masked, cdt
    bias = bias_ref[0]                                # (1, NLp)   f32 additive mask

    # query projection + InstanceNorm (global stats precomputed; the attention
    # scale key_channels**-0.5 is folded into qmul)
    q = jnp.dot(x, wq_ref[...],
                preferred_element_type=jnp.float32) + bq_ref[...]
    q = ((q - qmean_ref[0]) * qmul_ref[0]).astype(cdt)                 # (thw, Ck)

    dk = key_channels // num_heads
    dv = value_channels // num_heads
    heads = []
    for h in range(num_heads):                        # small static unroll
        # scores: q_h (thw, dk) @ k_h (dk, NLp) -- no transpose needed
        s = jnp.dot(q[:, h * dk:(h + 1) * dk], kT[h * dk:(h + 1) * dk, :],
                    preferred_element_type=jnp.float32)                # (thw, NLp)
        s = s + bias
        m = jnp.max(s, axis=-1, keepdims=True)
        p = jnp.exp(s - m)
        denom = jnp.sum(p, axis=-1, keepdims=True)
        p = (p * pl.reciprocal(denom)).astype(cdt)
        # PV: v already in (NLp, Cval) layout -> plain column slice, no transpose
        heads.append(jnp.dot(p, v[:, h * dv:(h + 1) * dv],
                             preferred_element_type=jnp.float32).astype(cdt))
    o_cat = jnp.concatenate(heads, axis=-1)           # (thw, Cval)  cdt

    # one full-contraction output projection (K = value_channels)
    y = jnp.dot(o_cat, wo_ref[...],
                preferred_element_type=jnp.float32) + bo_ref[...]      # (thw, Cval)
    y_ref[0] = y.astype(y_ref.dtype)

    # partial statistics for the output InstanceNorm from the f32 accumulator
    rows = (jax.lax.broadcasted_iota(jnp.int32, (block_hw, 1), 0)
            + pl.program_id(1) * block_hw)
    valid = (rows < hw).astype(jnp.float32)
    yv = y * valid
    s1 = jnp.sum(yv, axis=0, keepdims=True)
    s2 = jnp.sum(yv * y, axis=0, keepdims=True)
    ostats_ref[0, 0] = jnp.concatenate([s1, s2], axis=0)


# ---------------------------------------------------------------------------
# Pass 3: apply the output InstanceNorm.
# ---------------------------------------------------------------------------
def _norm_kernel(y_ref, mean_ref, mul_ref, out_ref):
    y = y_ref[0].astype(jnp.float32)
    out_ref[0] = ((y - mean_ref[0]) * mul_ref[0]).astype(out_ref.dtype)


def vision_language_attention(x, l, l_mask, params, *, num_heads,
                              block_hw=512, compute_dtype=jnp.bfloat16):
    """x: (B, HW, Cv_in), l: (B, Cl_in, N_l), l_mask: (B, N_l, 1) -> (B, HW, Cval) f32."""
    B, HW, cv_in = x.shape
    _, cl_in, n_l = l.shape
    key_channels = params["wq"].shape[1]
    value_channels = params["wv"].shape[1]
    assert key_channels % num_heads == 0 and value_channels % num_heads == 0

    f32 = jnp.float32
    cdt = jnp.dtype(compute_dtype)

    # --- tiling: balanced near-divisor HW tile (multiple of 8), lane-dense N_l ---
    n_hw = max(1, -(-HW // block_hw))
    thw = _round_up(-(-HW // n_hw), 8)
    hwp = thw * n_hw
    nlp = _round_up(n_l, 128)
    grid = (B, n_hw)

    x_p = x if hwp == HW else jnp.pad(x, ((0, 0), (0, hwp - HW), (0, 0)))

    # --- per-batch language-side operands (hoisted out of pass 2) ---
    mask = l_mask[..., 0].astype(f32)                                   # (B, N_l)
    kT = (jnp.einsum("bcn,ck->bkn", l, params["wk"])
          + jnp.transpose(params["bk"])[None]) * mask[:, None, :]       # (B, Ck, N_l)
    v = (jnp.einsum("bcn,cv->bnv", l, params["wv"])
         + params["bv"][None]) * mask[:, :, None]                       # (B, N_l, Cval)
    kT_p = jnp.pad(kT, ((0, 0), (0, 0), (0, nlp - n_l))).astype(cdt)    # (B, Ck, NLp)
    v_p = jnp.pad(v, ((0, 0), (0, nlp - n_l), (0, 0))).astype(cdt)      # (B, NLp, Cval)
    bias = (10000.0 * jnp.pad(mask, ((0, 0), (0, nlp - n_l)))
            - 10000.0)[:, None, :].astype(f32)                          # (B, 1, NLp)

    wq = params["wq"].astype(cdt)                    # (Cv, Ck)
    bq = params["bq"].astype(f32)                    # (1, Ck)
    wo = params["wo"].astype(cdt)                    # (Cval, Cval)
    bo = params["bo"].astype(f32)                    # (1, Cval)

    # --- VMEM budget sized to the pass-2 live set (+ headroom, capped for v7x) ---
    xsz = jnp.dtype(x_p.dtype).itemsize
    csz = cdt.itemsize
    blk = (thw * cv_in * xsz + key_channels * nlp * csz + nlp * value_channels * csz
           + nlp * 4 + 2 * key_channels * 4
           + cv_in * key_channels * csz + key_channels * 4
           + value_channels * value_channels * csz + value_channels * 4
           + thw * value_channels * csz + 2 * value_channels * 4)
    inter = (thw * key_channels * (4 + csz) + thw * nlp * (4 + csz)
             + thw * value_channels * (4 + 2 * csz))
    vmem_limit = int(min(56 << 20, max(2 * blk + 2 * inter + (4 << 20), 16 << 20)))
    cparams = pltpu.CompilerParams(
        dimension_semantics=("parallel", "parallel"),
        vmem_limit_bytes=vmem_limit)

    def const_spec(a):                               # weights / biases (never refetched)
        n = a.ndim
        return pl.BlockSpec(a.shape, lambda b, t: (0,) * n)

    def batch_spec(a):                               # small per-batch operands
        n = a.ndim
        return pl.BlockSpec((1,) + a.shape[1:], lambda b, t: (b,) + (0,) * (n - 1))

    x_spec = pl.BlockSpec((1, thw, cv_in), lambda b, t: (b, t, 0))
    y_spec = pl.BlockSpec((1, thw, value_channels), lambda b, t: (b, t, 0))

    # ---------------- pass 1: query InstanceNorm statistics ----------------
    qstats = pl.pallas_call(
        functools.partial(_qstats_kernel, hw=HW, block_hw=thw),
        out_shape=jax.ShapeDtypeStruct((B, n_hw, 2, key_channels), f32),
        grid_spec=pltpu.PrefetchScalarGridSpec(
            num_scalar_prefetch=0, grid=grid,
            in_specs=[x_spec, const_spec(wq), const_spec(bq)],
            out_specs=pl.BlockSpec((1, 1, 2, key_channels),
                                   lambda b, t: (b, t, 0, 0))),
        compiler_params=cparams,
    )(x_p, wq, bq)

    qmean = jnp.sum(qstats[:, :, 0, :], axis=1) / HW                    # (B, Ck)
    qvar = jnp.maximum(jnp.sum(qstats[:, :, 1, :], axis=1) / HW
                       - qmean * qmean, 0.0)
    qmul = jax.lax.rsqrt(qvar + EPS) * (key_channels ** -0.5)
    qmean_a = qmean[:, None, :]
    qmul_a = qmul[:, None, :]

    # ---------------- pass 2: attention + out-projection ----------------
    y, ostats = pl.pallas_call(
        functools.partial(_attn_kernel, num_heads=num_heads,
                          key_channels=key_channels,
                          value_channels=value_channels,
                          hw=HW, block_hw=thw),
        out_shape=(jax.ShapeDtypeStruct((B, hwp, value_channels), cdt),
                   jax.ShapeDtypeStruct((B, n_hw, 2, value_channels), f32)),
        grid_spec=pltpu.PrefetchScalarGridSpec(
            num_scalar_prefetch=0, grid=grid,
            in_specs=[x_spec,
                      batch_spec(kT_p), batch_spec(v_p), batch_spec(bias),
                      batch_spec(qmean_a), batch_spec(qmul_a),
                      const_spec(wq), const_spec(bq),
                      const_spec(wo), const_spec(bo)],
            out_specs=[y_spec,
                       pl.BlockSpec((1, 1, 2, value_channels),
                                    lambda b, t: (b, t, 0, 0))]),
        compiler_params=cparams,
    )(x_p, kT_p, v_p, bias, qmean_a, qmul_a, wq, bq, wo, bo)

    omean = jnp.sum(ostats[:, :, 0, :], axis=1) / HW
    ovar = jnp.maximum(jnp.sum(ostats[:, :, 1, :], axis=1) / HW
                       - omean * omean, 0.0)
    omul = jax.lax.rsqrt(ovar + EPS)
    omean_a = omean[:, None, :]
    omul_a = omul[:, None, :]

    # ---------------- pass 3: output InstanceNorm ----------------
    out = pl.pallas_call(
        _norm_kernel,
        out_shape=jax.ShapeDtypeStruct((B, hwp, value_channels), f32),
        grid_spec=pltpu.PrefetchScalarGridSpec(
            num_scalar_prefetch=0, grid=grid,
            in_specs=[y_spec, batch_spec(omean_a), batch_spec(omul_a)],
            out_specs=y_spec),
        compiler_params=cparams,
    )(y, omean_a, omul_a)

    return out[:, :HW, :]


# ---------------------------------------------------------------------------
# Pure-JAX f32 reference (mirror of the PyTorch forward) and parameter helper.
# ---------------------------------------------------------------------------
def _reference(x, l, l_mask, params, *, num_heads):
    hp = jax.lax.Precision.HIGHEST
    B, HW, _ = x.shape
    _, _, n_l = l.shape
    key_channels = params["wq"].shape[1]
    value_channels = params["wv"].shape[1]
    dk = key_channels // num_heads
    dv = value_channels // num_heads

    def inorm(y):  # normalize over the length axis per channel, biased variance
        mean = jnp.mean(y, axis=1, keepdims=True)
        var = jnp.mean((y - mean) ** 2, axis=1, keepdims=True)
        return (y - mean) / jnp.sqrt(var + EPS)

    lt = jnp.transpose(l, (0, 2, 1))                                    # (B, N_l, Cl)
    q = inorm(jnp.einsum("bhc,ck->bhk", x, params["wq"], precision=hp) + params["bq"])
    k = (jnp.einsum("bnc,ck->bnk", lt, params["wk"], precision=hp) + params["bk"]) * l_mask
    v = (jnp.einsum("bnc,cv->bnv", lt, params["wv"], precision=hp) + params["bv"]) * l_mask

    q = q.reshape(B, HW, num_heads, dk).transpose(0, 2, 1, 3)
    k = k.reshape(B, n_l, num_heads, dk).transpose(0, 2, 1, 3)
    v = v.reshape(B, n_l, num_heads, dv).transpose(0, 2, 1, 3)

    att = jnp.einsum("bhqd,bhkd->bhqk", q, k, precision=hp) * key_channels ** (-0.5)
    att = att + (10000.0 * l_mask[:, None, :, 0][:, :, None, :] - 10000.0)
    att = jax.nn.softmax(att, axis=-1)
    out = jnp.einsum("bhqk,bhkd->bhqd", att, v, precision=hp)
    out = out.transpose(0, 2, 1, 3).reshape(B, HW, value_channels)
    out = inorm(jnp.einsum("bhc,ck->bhk", out, params["wo"], precision=hp) + params["bo"])
    return out


def _init_params(key, v_in, l_in, key_channels, value_channels,
                 w_scale=1.0, b_scale=0.1):
    ks = jax.random.split(key, 8)
    return {
        "wq": w_scale * jax.random.normal(ks[0], (v_in, key_channels), jnp.float32),
        "bq": b_scale * jax.random.normal(ks[1], (1, key_channels), jnp.float32),
        "wk": w_scale * jax.random.normal(ks[2], (l_in, key_channels), jnp.float32),
        "bk": b_scale * jax.random.normal(ks[3], (1, key_channels), jnp.float32),
        "wv": w_scale * jax.random.normal(ks[4], (l_in, value_channels), jnp.float32),
        "bv": b_scale * jax.random.normal(ks[5], (1, value_channels), jnp.float32),
        "wo": w_scale * jax.random.normal(ks[6], (value_channels, value_channels), jnp.float32),
        "bo": b_scale * jax.random.normal(ks[7], (1, value_channels), jnp.float32),
    }


if __name__ == "__main__":
    # Small, module-consistent, well-conditioned shapes (unit-scale weights ->
    # InstanceNorm of the output is well-conditioned, so bf16 error stays small).
    B, HW, N_L = 2, 64, 10
    V_IN, L_IN = 32, 32
    KEY_CH, VAL_CH, NUM_HEADS = 32, 32, 2

    key = jax.random.PRNGKey(0)
    kx, kl, kp = jax.random.split(key, 3)

    x = jax.random.normal(kx, (B, HW, V_IN), jnp.float32)
    l = jax.random.normal(kl, (B, L_IN, N_L), jnp.float32)
    # mask: 1.0 for valid tokens, 0.0 for padding (last three tokens of batch 1)
    l_mask = jnp.ones((B, N_L, 1), jnp.float32)
    l_mask = l_mask.at[1, -3:, 0].set(0.0)

    params = _init_params(kp, V_IN, L_IN, KEY_CH, VAL_CH)

    out = jax.block_until_ready(
        vision_language_attention(x, l, l_mask, params, num_heads=NUM_HEADS))
    ref = jax.block_until_ready(
        _reference(x, l, l_mask, params, num_heads=NUM_HEADS))

    assert out.shape == (B, HW, VAL_CH)
    err = jnp.abs(out - ref)
    max_err = float(jnp.max(err))
    mean_err = float(jnp.mean(err))
    # bf16 MXU operands vs an f32 reference on an InstanceNorm'd (unit-variance)
    # output: a few percent absolute error is expected; structural bugs give O(1).
    assert max_err < 1.5e-1 and mean_err < 3e-2, (max_err, mean_err)
    print("KERNEL_OK")
</pallas_src>

<mosaic_0001>
module attributes {stable_mosaic.version = 11 : i64} {
  func.func @_qstats_kernel(%arg0: i32, %arg1: i32, %arg2: memref<1x64x32xf32, #tpu.memory_space<vmem>>, %arg3: memref<32x32xbf16, #tpu.memory_space<vmem>>, %arg4: memref<1x32xf32, #tpu.memory_space<vmem>>, %arg5: memref<1x1x2x32xf32, #tpu.memory_space<vmem>>) attributes {dimension_semantics = [#tpu.dimension_semantics<parallel>, #tpu.dimension_semantics<parallel>], iteration_bounds = array<i64: 2, 1>, scalar_prefetch = 0 : i64, scratch_operands = 0 : i64, tpu.core_type = #tpu.core_type<tc>, window_params = [{transform_indices = @transform_0, window_bounds = array<i64: 1, 64, 32>}, {pipeline_mode = #tpu.pipeline_mode<synchronous>, transform_indices = @transform_1, window_bounds = array<i64: 32, 32>}, {pipeline_mode = #tpu.pipeline_mode<synchronous>, transform_indices = @transform_2, window_bounds = array<i64: 1, 32>}, {transform_indices = @transform_3, window_bounds = array<i64: 1, 1, 2, 32>}]} {
    %c0 = arith.constant 0 : index
    %c0_0 = arith.constant 0 : index
    %c0_1 = arith.constant 0 : index
    %0 = vector.load %arg2[%c0, %c0_0, %c0_1] : memref<1x64x32xf32, #tpu.memory_space<vmem>>, vector<1x64x32xf32>
    %1 = vector.shape_cast %0 : vector<1x64x32xf32> to vector<64x32xf32>
    %2 = arith.truncf %1 : vector<64x32xf32> to vector<64x32xbf16>
    %c0_2 = arith.constant 0 : index
    %c0_3 = arith.constant 0 : index
    %3 = vector.load %arg3[%c0_2, %c0_3] : memref<32x32xbf16, #tpu.memory_space<vmem>>, vector<32x32xbf16>
    %cst = arith.constant dense<0.000000e+00> : vector<64x32xf32>
    %4 = tpu.matmul %2, %3, %cst {dimension_numbers = #tpu.dot_dimension_numbers<[1], [0], [0], [1], [0, 0, 1, 1], [], []>} : vector<64x32xbf16>, vector<32x32xbf16>, vector<64x32xf32> -> vector<64x32xf32>
    %c0_4 = arith.constant 0 : index
    %c0_5 = arith.constant 0 : index
    %5 = vector.load %arg4[%c0_4, %c0_5] : memref<1x32xf32, #tpu.memory_space<vmem>>, vector<1x32xf32>
    %6 = vector.broadcast %5 : vector<1x32xf32> to vector<64x32xf32>
    %7 = arith.addf %4, %6 : vector<64x32xf32>
    %8 = tpu.iota {dimensions = array<i32: 0>} : vector<64x1xi32>
    %c64_i32 = arith.constant 64 : i32
    %9 = arith.muli %arg1, %c64_i32 : i32
    %10 = vector.broadcast %9 : i32 to vector<64x1xi32>
    %11 = arith.addi %8, %10 : vector<64x1xi32>
    %c64_i32_6 = arith.constant 64 : i32
    %12 = vector.broadcast %c64_i32_6 : i32 to vector<64x1xi32>
    %13 = arith.cmpi slt, %11, %12 : vector<64x1xi32>
    %14 = arith.extui %13 : vector<64x1xi1> to vector<64x1xi32>
    %15 = arith.sitofp %14 : vector<64x1xi32> to vector<64x1xf32>
    %16 = vector.broadcast %15 : vector<64x1xf32> to vector<64x32xf32>
    %17 = arith.mulf %7, %16 : vector<64x32xf32>
    %cst_7 = arith.constant dense<0.000000e+00> : vector<32xf32>
    %18 = vector.multi_reduction <add>, %17, %cst_7 [0] : vector<64x32xf32> to vector<32xf32>
    %19 = vector.shape_cast %18 : vector<32xf32> to vector<1x32xf32>
    %20 = arith.mulf %17, %7 : vector<64x32xf32>
    %cst_8 = arith.constant dense<0.000000e+00> : vector<32xf32>
    %21 = vector.multi_reduction <add>, %20, %cst_8 [0] : vector<64x32xf32> to vector<32xf32>
    %22 = vector.shape_cast %21 : vector<32xf32> to vector<1x32xf32>
    %23 = tpu.concatenate %19, %22 in 0 : vector<1x32xf32>, vector<1x32xf32> -> vector<2x32xf32>
    %c0_9 = arith.constant 0 : index
    %c0_10 = arith.constant 0 : index
    %c0_11 = arith.constant 0 : index
    %c0_12 = arith.constant 0 : index
    %24 = vector.load %arg5[%c0_9, %c0_10, %c0_11, %c0_12] : memref<1x1x2x32xf32, #tpu.memory_space<vmem>>, vector<1x1x2x32xf32>
    %25 = vector.shape_cast %24 : vector<1x1x2x32xf32> to vector<2x32xf32>
    %26 = vector.shape_cast %23 : vector<2x32xf32> to vector<1x1x2x32xf32>
    tpu.vector_store %arg5[%c0_9, %c0_10, %c0_11, %c0_12], %26 {strides = array<i32>} : memref<1x1x2x32xf32, #tpu.memory_space<vmem>>, vector<1x1x2x32xf32>,
    return
  }
  func.func @transform_0(%arg0: i32, %arg1: i32) -> (i32, i32, i32) {
    %c0_i32 = arith.constant 0 : i32
    %c0_i32_0 = arith.constant 0 : i32
    return %arg0, %arg1, %c0_i32 : i32, i32, i32
  }
  func.func @transform_1(%arg0: i32, %arg1: i32) -> (i32, i32) {
    %c0_i32 = arith.constant 0 : i32
    %c0_i32_0 = arith.constant 0 : i32
    %c0_i32_1 = arith.constant 0 : i32
    return %c0_i32, %c0_i32_0 : i32, i32
  }
  func.func @transform_2(%arg0: i32, %arg1: i32) -> (i32, i32) {
    %c0_i32 = arith.constant 0 : i32
    %c0_i32_0 = arith.constant 0 : i32
    %c0_i32_1 = arith.constant 0 : i32
    return %c0_i32, %c0_i32_0 : i32, i32
  }
  func.func @transform_3(%arg0: i32, %arg1: i32) -> (i32, i32, i32, i32) {
    %c0_i32 = arith.constant 0 : i32
    %c0_i32_0 = arith.constant 0 : i32
    %c0_i32_1 = arith.constant 0 : i32
    return %arg0, %arg1, %c0_i32, %c0_i32_0 : i32, i32, i32, i32
  }
}

</mosaic_0001>

<bundles_post_ra>
// kernel: tpu_custom_call.1
= control target key start
LH: loop header
LB: loop body
LE: loop exit
PB: predicated region body
PF: predicated region fallthrough
CT: control target
= control target key end

     0   :  { %8 = vsyncpa [#allocation3], 0  ;;  %s848_s0 = inlined_call_operand.vmem [shape: f32[2,64,32], index: 0, kind: input, shape index: {}]   ;;  %s849_s1 = inlined_call_operand.vmem [shape: bf16[32,32], index: 1, kind: input, shape index: {}]   ;;  %s850_s2 = inlined_call_operand.vmem [shape: f32[1,32], index: 2, kind: input, shape index: {}]   ;;  %s851_s3 = inlined_call_operand.hbm [shape: f32[2,1,2,32], index: 3, kind: output, shape index: {}]  }
   0x1   :  { %10 = vsyncpa [#allocation3 + $0x1], 0  ;;  %s707_s12 = smov 0   ;;  %s709_s13 = smov 0  }
   0x2   :  { %s711_s14 = smov 0   ;;  %s713_s15 = smov 0  }
   0x3   :  { %s715_s16 = smov 0   ;;  %s717_s17 = smov 0  }
   0x4 LB: > { %s507_s18 = sadd.s32 4294967295, %s684_s17   ;;  %s508_s19 = sadd.s32 4294967294, %s684_s17   ;;  %s684_s17 = sphi %s717_s17, %s16_s17   ;;  %s680_s16 = sphi %s715_s16, %s858_s16   ;;  %s676_s15 = sphi %s713_s15, %s857_s15   ;;  %s672_s14 = sphi %s711_s14, %s856_s14   ;;  %s668_s13 = sphi %s709_s13, %s855_s13   ;;  %s664_s12 = sphi %s707_s12, %s854_s12  }
   0x5   : > { %s28_s20 = sadd.s32 1, %s680_s16  ;;  %s107_s21 = sadd.s32 1, %s672_s14 }
   0x6   : > { %p30_p0 = scmp.ge.s32.totalorder %s28_s20, 2  ;;  %p117_p1 = scmp.ne.s32.totalorder %s672_s14, %s668_s13 }
   0x7   : > { %p118_p2 = scmp.eq.s32.totalorder %s507_s18, 1  ;;  %p123_p3 = scmp.ne.s32.totalorder %s668_s13, %s664_s12 }
   0x8   : > { %s860_s20 = smov (%p30_p0, %s28_s20), 0  ;;  %p124_p5 = scmp.eq.s32.totalorder %s508_s19, 1 }
   0x9   : > { %p747_p4 = por %p118_p2, %p117_p1  ;;  %s102_s23 = ssub.s32 %s680_s16, %s860_s20 }
   0xa   : > { %p511_p6 = scmp.ge.s32.totalorder %s684_s17, 1  ;;  %p105_p7 = scmp.eq.s32.totalorder %s102_s23, 0 }
   0xb   : > { %p754_p8 = por %p124_p5, %p123_p3  ;;  %p161_p9 = scmp.lt.s32.totalorder %s684_s17, 3 }
   0xc   : > { %s760_s25 = scalar_select %p105_p7, %s672_s14, %s107_s21  }
   0xd   : > { %p162_p10 = pnand %p511_p6, %p161_p9 }
   0xe   : > { %v604_v0 = vld [vmem:[%s849_s1] sm:$0xff] (!%p162_p10)   ;;  %p190_p11 = scmp.lt.s32.totalorder (!%p162_p10), %s676_s15, 1  ;;  %v605_v1 = vld [vmem:[%s849_s1 + $0x8] sm:$0xff] (!%p162_p10)   ;;  %vm235_vm0 = vcmask (!%p162_p10), 261120   ;;  %s186_s10 = sand.u32 (!%p162_p10), 1, %s668_s13   ;;  %vm414_vm1 = vcmask (!%p162_p10), 1040384  }
   0xf   : > { %165 = sbr.rel (%p162_p10) target bundleno = 291 (0x123), region = 32  ;;  %533 = vmatprep.subr.bf16.mxu0 (!%p162_p10), %v604_v0  ;;  %545 = vmatprep.subr.bf16.mxu1 (!%p162_p10), %v604_v0  ;;  %v515_v14 = vld [vmem:[%s850_s2] ss:$0 sm:$0xff] (!%p162_p10)  ;;  %s512_s11 = sshll.u32 (!%p162_p10), %s186_s10, 1  ;;  %vm416_vm2 = vcmask (!%p162_p10), 254976  }
  0x10   : > { %534 = vmatpush3.bf16.msra.mxu0 (!%p162_p10), %v604_v0  ;;  %547 = vmatpush3.bf16.msra.mxu1 (!%p162_p10), %v604_v0  ;;  %s523_s18 = sshll.u32 (!%p162_p10), %s676_s15, 5  ;;  %s188_s19 = scalar_lea.vmem (!%p162_p10), [#allocation2], %s512_s11 }
  0x11   : > { %535 = vmatprep.subr.bf16.mxu0 (!%p162_p10), %v605_v1  ;;  %546 = vmatprep.subr.bf16.mxu1 (!%p162_p10), %v605_v1  ;;  %s433_s21 = sshll.u32 (!%p162_p10), %s188_s19, 4  ;;  %s801_s27 = scalar_lea.hbm (!%p162_p10), %s851_s3, %s523_s18  ;;  %s803_s21 = int_to_ptr.vmem [resolvable:$true] %s433_s21 }
  0x12   : > { %s419_s28 = scalar_lea.sflag (!%p162_p10), [#allocation3], %s186_s10  ;;  %s686_s29 = smov (!%p162_p10), [#allocation2]  }
  0x14   : > { %536 = vmatpush3.bf16.msra.mxu0 (!%p162_p10), %v605_v1  ;;  %548 = vmatpush3.bf16.msra.mxu1 (!%p162_p10), %v605_v1 }
  0x16   : > { %s191_s30 = scalar_select %p190_p11, %s676_s15, 1 }
  0x17   : > { %s606_s15 = scalar_lea.vmem %s803_s21, 32 }
  0x18   : > { %s526_s4 = sshll.u32 %s191_s30, 6  ;;  %p607_p12 = scmp.ne.s32.totalorder %s803_s21, %s606_s15 }
  0x19   : > { %s197_s7 = scalar_lea.vmem %s848_s0, %s526_s4  ;;  %s610_s30 = sshll.u32 %s686_s29, 4  ;;  %s611_s30 = int_to_ptr.vmem [resolvable:$false] %s610_s30 }
  0x1a   : > { %v200_v2 = vld [vmem:[%s197_s7] sm:$0xff]  ;;  %v201_v3 = vld [vmem:[%s197_s7 + $0x8] sm:$0xff]  ;;  %v202_v4 = vld [vmem:[%s197_s7 + $0x10] sm:$0xff]  ;;  %p608_p13 = pnand %p607_p12, %p747_p4  ;;  %s612_s4 = scalar_lea.vmem %s611_s30, 64 }
  0x1b   : > { %v208_v5 = vpack.c.bf16 %v201_v3, %v200_v2  ;;  %v203_v6 = vld [vmem:[%s197_s7 + $0x18] sm:$0xff]  ;;  %v204_v7 = vld [vmem:[%s197_s7 + $0x20] sm:$0xff]  ;;  %v205_v8 = vld [vmem:[%s197_s7 + $0x28] sm:$0xff]  ;;  %p613_p1 = scmp.lt.s32.totalorder %s803_s21, %s611_s30  ;;  %p614_p2 = scmp.lt.s32.totalorder %s612_s4, %s606_s15 }
  0x1c   : > { %v209_v9 = vpack.c.bf16 %v203_v6, %v202_v4  ;;  %v210_v10 = vpack.c.bf16 %v205_v8, %v204_v7  ;;  %v206_v11 = vld [vmem:[%s197_s7 + $0x30] sm:$0xff]  ;;  %v207_v12 = vld [vmem:[%s197_s7 + $0x38] sm:$0xff]  ;;  %p609_p0 = pneg %p608_p13 }
  0x1d   : > { %537 = vmatprep.mubr.msk.bf16.mxu0 %vm235_vm0, %v208_v5  ;;  %v211_v13 = vpack.c.bf16 %v207_v12, %v206_v11  ;;  %p615_p3 = por %p614_p2, %p613_p1 }
  0x1e   : > { %538 = vmatmul.mubr.msk.bf16.vlgmr.msra.gmra.mrb[0].mxu0 %vm235_vm0, %v209_v9  ;;  %541 = vmatprep.mubr.msk.bf16.mxu1 %vm235_vm0, %v210_v10 }
  0x1f   : > { %542 = vmatmul.mubr.msk.bf16.vlgmr.msra.gmra.mrb[0].mxu1 %vm235_vm0, %v211_v13  ;;  %p616_p5 = pnand %p615_p3, %p609_p0 }
  0xf1   : > { %v539_v15 = vpop.f32.mrb[0].mxu0 }
  0xf2   : > { %v282_v16 = vpop.f32.mrb[1].mxu0  ;;  %v543_v17 = vpop.f32.mrb[0].mxu1  ;;  %v291_v18 = vadd.f32 %v539_v15, %v515_v14 }
  0xf3   : > { %v283_v19 = vadd.f32 %v515_v14, %v282_v16  ;;  %v540_v20 = vpop.f32.mrb[2].mxu0  ;;  %v298_v21 = vpop.f32.mrb[1].mxu1  ;;  %v307_v44 = vadd.f32 %v543_v17, %v515_v14 }
  0xf4   : > { %v294_v22 = vadd.f32 %v540_v20, %v515_v14  ;;  %v285_v23 = vpop.f32.mrb[3].mxu0  ;;  %v544_v24 = vpop.f32.mrb[2].mxu1  ;;  %v299_v27 = vadd.f32 %v515_v14, %v298_v21  ;;  %v387_v29 = vmul.f32 %v291_v18, %v291_v18  ;;  %v367_v33 = vsel %vm235_vm0, %v291_v18, 0.0 }
  0xf5   : > { %v385_v25 = vmul.f32 %v283_v19, %v283_v19  ;;  %v286_v26 = vadd.f32 %v515_v14, %v285_v23  ;;  %v301_v28 = vpop.f32.mrb[3].mxu1  ;;  %v364_v30 = vsel %vm235_vm0, %v283_v19, 0.0  ;;  %v310_v50 = vadd.f32 %v544_v24, %v515_v14 }
  0xf6   : > { %v388_v34 = vmul.f32 %v294_v22, %v294_v22  ;;  %v389_v38 = vmul.f32 %v299_v27, %v299_v27  ;;  %v302_v39 = vadd.f32 %v515_v14, %v301_v28  ;;  %v396_v42 = vsel %vm235_vm0, %v387_v29, 0.0 }
  0xf7   : > { %v365_v31 = vsel %vm235_vm0, %v286_v26, 0.0  ;;  %v386_v32 = vmul.f32 %v286_v26, %v286_v26  ;;  %v393_v36 = vsel %vm235_vm0, %v385_v25, 0.0  ;;  %v369_v43 = vsel %vm235_vm0, %v294_v22, 0.0 }
  0xf8   : > { %v366_v35 = vadd.f32 %v365_v31, %v364_v30  ;;  %v371_v45 = vsel %vm235_vm0, %v299_v27, 0.0  ;;  %v398_v48 = vsel %vm235_vm0, %v388_v34, 0.0  ;;  %v400_v49 = vsel %vm235_vm0, %v389_v38, 0.0 }
  0xf9   : > { %v394_v37 = vsel %vm235_vm0, %v386_v32, 0.0  ;;  %v390_v51 = vmul.f32 %v302_v39, %v302_v39  ;;  %v391_v54 = vmul.f32 %v307_v44, %v307_v44  ;;  %v373_v55 = vsel %vm235_vm0, %v302_v39, 0.0 }
  0xfa   : > { %v368_v40 = vadd.f32 %v367_v33, %v366_v35  ;;  %v395_v41 = vadd.f32 %v394_v37, %v393_v36  ;;  %v375_v58 = vsel %vm235_vm0, %v307_v44, 0.0  ;;  %v392_v59 = vmul.f32 %v310_v50, %v310_v50 }
  0xfb   : > { %v402_v60 = vsel %vm235_vm0, %v390_v51, 0.0  ;;  %v404_v63 = vsel %vm235_vm0, %v391_v54, 0.0  ;;  %v377_v0 = vsel %vm235_vm0, %v310_v50, 0.0 }
  0xfc   : > { %v397_v46 = vadd.f32 %v396_v42, %v395_v41  ;;  %v370_v47 = vadd.f32 %v369_v43, %v368_v40  ;;  %v406_v3 = vsel %vm235_vm0, %v392_v59, 0.0 }
  0xfe   : > { %v372_v52 = vadd.f32 %v371_v45, %v370_v47  ;;  %v399_v53 = vadd.f32 %v398_v48, %v397_v46 }
 0x100   : > { %v401_v56 = vadd.f32 %v400_v49, %v399_v53  ;;  %v374_v57 = vadd.f32 %v373_v55, %v372_v52 }
 0x102   : > { %v376_v61 = vadd.f32 %v375_v58, %v374_v57  ;;  %v403_v62 = vadd.f32 %v402_v60, %v401_v56 }
 0x104   : > { %v378_v1 = vadd.f32 %v377_v0, %v376_v61  ;;  %v405_v2 = vadd.f32 %v404_v63, %v403_v62 }
 0x106   : > { %v379_v4 = vrot.slane %v378_v1, 4  ;;  %v407_v5 = vadd.f32 %v406_v3, %v405_v2 }
 0x108   : > { %v380_v6 = vadd.f32 %v379_v4, %v378_v1  ;;  %v408_v7 = vrot.slane %v407_v5, 4 }
 0x10a   : > { %v381_v8 = vrot.slane %v380_v6, 2  ;;  %v409_v9 = vadd.f32 %v408_v7, %v407_v5 }
 0x10c   : > { %v382_v10 = vadd.f32 %v381_v8, %v380_v6  ;;  %v410_v11 = vrot.slane %v409_v9, 2 }
 0x10e   : > { %v383_v12 = vrot.slane %v382_v10, 1  ;;  %v411_v13 = vadd.f32 %v410_v11, %v409_v9 }
 0x110   : > { %v412_v14 = vrot.slane %v411_v13, 1  ;;  %v384_v15 = vadd.f32 %v383_v12, %v382_v10 }
 0x112   : > { %v413_v16 = vadd.f32 %v412_v14, %v411_v13 }
 0x114   : > { %v415_v17 = vsel %vm414_vm1, %v384_v15, %v413_v16 }
 0x115   : > { %417 = vst.msk [vmem:[%s188_s19] sm:$0x3] %vm416_vm2, %v415_v17 }
 0x116   : > { %619 = shalt.err (!%p616_p5)
}
 0x117   : > { %s620_s5 = scalar_lea.hbm %s801_s27, 32  ;;  %s624_s8 = scalar_lea.hbm %s851_s3, 64 }
 0x118   : > { %p621_p6 = scmp.ne.s32.totalorder %s801_s27, %s620_s5  ;;  %p625_p10 = scmp.lt.u32.totalorder %s801_s27, %s851_s3 }
 0x119   : > { %p626_p11 = scmp.lt.u32.totalorder %s624_s8, %s620_s5  ;;  %p628_p13 = scmp.lt.u32.totalorder %s620_s5, %s801_s27 }
 0x11a   : > { %p622_p7 = pnand %p621_p6, %p747_p4 }
 0x11b   : > { %p627_p12 = por %p626_p11, %p625_p10 }
 0x11c   : > { %p623_p9 = pneg %p622_p7 }
 0x11d   : > { %p629_p0 = por %p628_p13, %p627_p12 }
 0x11f   : > { %p630_p1 = pnand %p629_p0, %p623_p9 }
 0x121   : > { %633 = shalt.err (!%p630_p1)
}
 0x122   : > { %549 = dma.vmem_to_hbm [thread:$0]  (%p747_p4), %s803_s21, 32, %s801_s27, %s419_s28  }
 0x123 PF: > { %p555_p2 = scmp.ge.s32.totalorder %s684_s17, 2  ;;  %s445_s11 = sand.u32 1, %s664_s12  }
 0x124   : > { %s446_s18 = scalar_lea.sflag [#allocation3], %s445_s11 }
 0x125   : > { %p552_p3 = pnand %p555_p2, %p754_p8 }
 0x127   : > { %659 = dma.done.wait (!%p552_p3), %s446_s18, 32  }
 0x128   : > { %661 = vsyncadd (!%p552_p3), %s446_s18, 4294967264  ;;  %s16_s17 = sadd.s32 1, %s684_s17   ;;  %s854_s12 = smov %s668_s13 }
 0x129   : > { %p13_p5 = scmp.ge.s32.totalorder %s16_s17, 4   ;;  %s855_s13 = smov %s672_s14 }
 0x12a   : > { %s856_s14 = smov %s760_s25  ;;  %s857_s15 = smov %s680_s16 }
 0x12b   : > { %s858_s16 = smov %s860_s20  ;;  %15 = sbr.rel (!%p13_p5) target bundleno = 4 (0x4), region = 67 }
 0x132   :  { %451 = vsyncpa [#allocation3], 1 }
 0x133   :  { %453 = vsyncpa [#allocation3 + $0x1], 1 }

</bundles_post_ra>
